<compile_context>
chip_gen: v5e
topology: v5e:2x2
jax: 0.10.0
libtpu: 0.0.40
codegen_flags: <defaults>
</compile_context>

<pallas_src>
import jax
import jax.numpy as jnp
from jax.experimental import pallas as pl
from jax.experimental.pallas import tpu as pltpu


# ----------------------------------------------------------------------------
# Kernel bodies
# ----------------------------------------------------------------------------
def _inpaint_cfg_kernel(sigma_ref, mod_ref, w_ref, bias_ref,
                        x_ref, noise_ref, latent_ref, mask_ref, out_ref):
    """Masked (inpaint) path.  Grid step = (batch element b, spatial row tile p).

    sigma_ref : SMEM (N,)              f32
    mod_ref   : SMEM (N,)              f32    precomputed 1/(sigma^2+1)
    w_ref     : SMEM (C, C)            f32    channel-mix weight
    bias_ref  : SMEM (N, C)            f32    fused CFG bias  b_u + s*(b_c - b_u)
    x_ref     : VMEM (1, C,  rblk,128) f32
    noise_ref : VMEM (1, C,  rblk,128) f32
    latent_ref: VMEM (1, C,  rblk,128) f32
    mask_ref  : VMEM (1, Cm, rblk,128) f32    Cm in {1, C}
    out_ref   : VMEM (1, C,  rblk,128) f32
    """
    b = pl.program_id(0)
    sig = sigma_ref[b]
    mod = mod_ref[b]
    C = x_ref.shape[1]
    Cm = mask_ref.shape[1]

    m_shared = mask_ref[0, 0] if Cm == 1 else None

    # inpaint pre-mix (FMA form): x_in = base + (x - base)*m,  base = lat + noise*sig
    x_in = []
    for k in range(C):
        m = mask_ref[0, k] if Cm == C else m_shared
        base = latent_ref[0, k] + noise_ref[0, k] * sig
        x_in.append(base + (x_ref[0, k] - base) * m)

    # channel mix (scalar * vector MACs on the VPU), sigma modulation,
    # fused CFG rank-1 bias, inpaint post-mix.
    for c in range(C):
        h = x_in[0] * w_ref[c, 0]
        for k in range(1, C):
            h = h + x_in[k] * w_ref[c, k]
        den = h * mod + bias_ref[b, c]
        m = mask_ref[0, c] if Cm == C else m_shared
        lat = latent_ref[0, c]
        out_ref[0, c] = (lat + (den - lat) * m).astype(out_ref.dtype)


def _cfg_only_kernel(mod_ref, w_ref, bias_ref, x_ref, out_ref):
    """denoise_mask=None path: reads only x, writes only out."""
    b = pl.program_id(0)
    mod = mod_ref[b]
    C = x_ref.shape[1]

    xs = [x_ref[0, k] for k in range(C)]
    for c in range(C):
        h = xs[0] * w_ref[c, 0]
        for k in range(1, C):
            h = h + xs[k] * w_ref[c, k]
        out_ref[0, c] = (h * mod + bias_ref[b, c]).astype(out_ref.dtype)


# ----------------------------------------------------------------------------
# Tiling helpers
# ----------------------------------------------------------------------------
_VMEM_TILE_BUDGET = 12 * 1024 * 1024       # double-buffered working-set target
_VMEM_LIMIT_BYTES = 32 * 1024 * 1024       # explicit scoped-VMEM limit


def _choose_rblk(R, per_row_bytes, n_batch):
    """Rows (sublanes) per spatial tile.

    Largest multiple of 8 that divides R while keeping the double-buffered
    in/out working set within the VMEM budget, and (when possible) leaving
    >= 2 grid blocks so both v7x TensorCores get work.
    """
    if R % 8 != 0:
        return R                           # full-extent fallback (tiny inputs)
    max_rows = (_VMEM_TILE_BUDGET // (2 * per_row_bytes)) // 8 * 8
    max_rows = max(8, max_rows)
    blk = (min(R, max_rows) // 8) * 8
    while R % blk != 0:
        blk -= 8
    if n_batch * (R // blk) < 2:           # give the 2nd TensorCore a block
        half = (R // 2 // 8) * 8
        while half >= 8 and R % half != 0:
            half -= 8
        if half >= 8:
            blk = half
    return blk


# ----------------------------------------------------------------------------
# Wrapper
# ----------------------------------------------------------------------------
def ksampler_x0_inpaint_forward(x, sigma, uncond, cond, cond_scale,
                                denoise_mask, latent_image, noise, Wc, Vc,
                                cond_concat=None):
    """Exact KSamplerX0Inpaint.forward semantics with the synthetic inner model.

    x, latent_image, noise : (N, C, H, W) f32
    sigma                  : (N,) f32
    uncond, cond           : (N, T, E) f32
    denoise_mask           : broadcastable to (N, 1|C, H, W) f32, or None
    """
    # TODO(synk): cond_concat is accepted but unused by the synthetic inner model.
    N, C, H, W = x.shape
    P = H * W
    Ppad = ((P + 127) // 128) * 128
    R = Ppad // 128

    def to_tiles(a, ch):
        a = a.reshape(N, ch, P).astype(jnp.float32)
        if Ppad != P:
            a = jnp.pad(a, ((0, 0), (0, 0), (0, Ppad - P)))
        return a.reshape(N, ch, R, 128)

    x_t = to_tiles(x, C)

    sigma = sigma.astype(jnp.float32).reshape(N)
    mod = 1.0 / (sigma * sigma + 1.0)                        # (N,)

    # CFG collapses to a rank-1 bias (exact: linear denoiser, shared x & sigma)
    Vc32 = Vc.astype(jnp.float32)
    bias_c = jnp.mean(cond.astype(jnp.float32), axis=1) @ Vc32.T   # (N, C)
    bias_u = jnp.mean(uncond.astype(jnp.float32), axis=1) @ Vc32.T
    bias = (bias_u + (bias_c - bias_u) * cond_scale).astype(jnp.float32)

    w = Wc.astype(jnp.float32)

    smem = pl.BlockSpec(memory_space=pltpu.MemorySpace.SMEM)

    if denoise_mask is None:
        per_row_bytes = 2 * C * 128 * 4                      # x + out
        rblk = _choose_rblk(R, per_row_bytes, N)
        grid = (N, R // rblk)
        bytes_accessed = int(2 * C * N * Ppad * 4)
        flops = int(N * C * Ppad * (2 * C + 2))
        out_t = pl.pallas_call(
            _cfg_only_kernel,
            out_shape=jax.ShapeDtypeStruct((N, C, R, 128), jnp.float32),
            grid_spec=pltpu.PrefetchScalarGridSpec(
                num_scalar_prefetch=0,
                grid=grid,
                in_specs=[
                    smem,                                              # mod
                    smem,                                              # Wc
                    smem,                                              # bias
                    pl.BlockSpec((1, C, rblk, 128), lambda b, p: (b, 0, p, 0)),  # x
                ],
                out_specs=pl.BlockSpec((1, C, rblk, 128), lambda b, p: (b, 0, p, 0)),
            ),
            compiler_params=pltpu.CompilerParams(
                dimension_semantics=("parallel", "parallel"),
                vmem_limit_bytes=_VMEM_LIMIT_BYTES),
            cost_estimate=pl.CostEstimate(flops=flops, transcendentals=0,
                                          bytes_accessed=bytes_accessed),
        )(mod, w, bias, x_t)
    else:
        m = jnp.asarray(denoise_mask, jnp.float32)
        m = jnp.broadcast_to(m, jnp.broadcast_shapes(m.shape, (N, 1, H, W)))
        Cm = m.shape[1]
        assert Cm in (1, C), f"unsupported denoise_mask channel dim {Cm}"
        m_t = to_tiles(m, Cm)
        lat_t = to_tiles(latent_image, C)
        nz_t = to_tiles(noise, C)

        per_row_bytes = (4 * C + Cm) * 128 * 4               # x, noise, lat, out, mask
        rblk = _choose_rblk(R, per_row_bytes, N)
        grid = (N, R // rblk)
        bytes_accessed = int((4 * C + Cm) * N * Ppad * 4)
        flops = int(N * C * Ppad * (2 * C + 10))
        out_t = pl.pallas_call(
            _inpaint_cfg_kernel,
            out_shape=jax.ShapeDtypeStruct((N, C, R, 128), jnp.float32),
            grid_spec=pltpu.PrefetchScalarGridSpec(
                num_scalar_prefetch=0,
                grid=grid,
                in_specs=[
                    smem,                                              # sigma
                    smem,                                              # mod
                    smem,                                              # Wc
                    smem,                                              # bias
                    pl.BlockSpec((1, C, rblk, 128), lambda b, p: (b, 0, p, 0)),   # x
                    pl.BlockSpec((1, C, rblk, 128), lambda b, p: (b, 0, p, 0)),   # noise
                    pl.BlockSpec((1, C, rblk, 128), lambda b, p: (b, 0, p, 0)),   # latent
                    pl.BlockSpec((1, Cm, rblk, 128), lambda b, p: (b, 0, p, 0)),  # mask
                ],
                out_specs=pl.BlockSpec((1, C, rblk, 128), lambda b, p: (b, 0, p, 0)),
            ),
            compiler_params=pltpu.CompilerParams(
                dimension_semantics=("parallel", "parallel"),
                vmem_limit_bytes=_VMEM_LIMIT_BYTES),
            cost_estimate=pl.CostEstimate(flops=flops, transcendentals=0,
                                          bytes_accessed=bytes_accessed),
        )(sigma, mod, w, bias, x_t, nz_t, lat_t, m_t)

    out = out_t.reshape(N, C, Ppad)
    if Ppad != P:
        out = out[:, :, :P]
    return out.reshape(N, C, H, W)


# ----------------------------------------------------------------------------
# Pure-JAX reference (mirrors the torch module structure: two inner-model
# evaluations + CFG combine, explicit pre/post masking)
# ----------------------------------------------------------------------------
def _inner_model_ref(x_flat, sigma, cond_te, Wc, Vc):
    mod = 1.0 / (sigma ** 2 + 1.0)
    h = jnp.einsum('ck,bkp->bcp', Wc, x_flat,
                   precision=jax.lax.Precision.HIGHEST) * mod[:, None, None]
    bias = jnp.mean(cond_te, axis=1) @ Vc.T                  # (B, C)
    return h + bias[:, :, None]


def _ksampler_ref(x, sigma, uncond, cond, cond_scale, denoise_mask,
                  latent_image, noise, Wc, Vc):
    N, C, H, W = x.shape
    P = H * W
    x_flat = x.reshape(N, C, P)
    if denoise_mask is not None:
        m = jnp.broadcast_to(jnp.asarray(denoise_mask, jnp.float32),
                             jnp.broadcast_shapes(jnp.shape(denoise_mask),
                                                  (N, 1, H, W)))
        m = m.reshape(N, -1, P)
        lm = 1.0 - m
        lat = latent_image.reshape(N, C, P)
        nz = noise.reshape(N, C, P)
        x_flat = x_flat * m + (lat + nz * sigma[:, None, None]) * lm
    d_c = _inner_model_ref(x_flat, sigma, cond, Wc, Vc)
    d_u = _inner_model_ref(x_flat, sigma, uncond, Wc, Vc)
    out = d_u + (d_c - d_u) * cond_scale
    if denoise_mask is not None:
        out = out * m + lat * lm
    return out.reshape(N, C, H, W)


# ----------------------------------------------------------------------------
if __name__ == "__main__":
    N, C, H, W = 2, 4, 16, 16          # latent x: NCHW
    T, E = 8, 32                       # conditioning tokens / embed dim
    cond_scale = 7.5

    key = jax.random.PRNGKey(0)
    kx, ks, ku, kc, km, kl, kn, kw, kv, km2 = jax.random.split(key, 10)

    x = jax.random.normal(kx, (N, C, H, W), dtype=jnp.float32)
    sigma = jax.random.uniform(ks, (N,), dtype=jnp.float32, minval=0.1, maxval=2.0)
    uncond = jax.random.normal(ku, (N, T, E), dtype=jnp.float32)
    cond = jax.random.normal(kc, (N, T, E), dtype=jnp.float32)
    denoise_mask = jax.random.uniform(km, (N, 1, H, W), dtype=jnp.float32)
    denoise_mask_pc = jax.random.uniform(km2, (N, C, H, W), dtype=jnp.float32)
    latent_image = jax.random.normal(kl, (N, C, H, W), dtype=jnp.float32)
    noise = jax.random.normal(kn, (N, C, H, W), dtype=jnp.float32)

    # deterministic synthetic inner-model weights
    Wc = jnp.eye(C, dtype=jnp.float32) + 0.1 * jax.random.normal(kw, (C, C), jnp.float32)
    Vc = 0.1 * jax.random.normal(kv, (C, E), dtype=jnp.float32)

    # 1) inpaint path (single-channel denoise_mask)
    out = ksampler_x0_inpaint_forward(x, sigma, uncond, cond, cond_scale,
                                      denoise_mask, latent_image, noise, Wc, Vc)
    out = jax.block_until_ready(out)
    ref = _ksampler_ref(x, sigma, uncond, cond, cond_scale, denoise_mask,
                        latent_image, noise, Wc, Vc)
    assert out.shape == (N, C, H, W)
    assert bool(jnp.allclose(out, ref, atol=1e-4, rtol=1e-4)), "mismatch (masked path)"

    # 2) denoise_mask = None path (specialized mask-free kernel)
    out2 = ksampler_x0_inpaint_forward(x, sigma, uncond, cond, cond_scale,
                                       None, latent_image, noise, Wc, Vc)
    out2 = jax.block_until_ready(out2)
    ref2 = _ksampler_ref(x, sigma, uncond, cond, cond_scale, None,
                         latent_image, noise, Wc, Vc)
    assert bool(jnp.allclose(out2, ref2, atol=1e-4, rtol=1e-4)), "mismatch (no-mask path)"

    # 3) per-channel denoise_mask path
    out3 = ksampler_x0_inpaint_forward(x, sigma, uncond, cond, cond_scale,
                                       denoise_mask_pc, latent_image, noise, Wc, Vc)
    out3 = jax.block_until_ready(out3)
    ref3 = _ksampler_ref(x, sigma, uncond, cond, cond_scale, denoise_mask_pc,
                         latent_image, noise, Wc, Vc)
    assert bool(jnp.allclose(out3, ref3, atol=1e-4, rtol=1e-4)), "mismatch (per-channel mask)"

    print("KERNEL_OK")
</pallas_src>

<mosaic_0001>
module attributes {stable_mosaic.version = 11 : i64} {
  func.func @_inpaint_cfg_kernel(%arg0: i32, %arg1: i32, %arg2: memref<2xf32, #tpu.memory_space<smem>>, %arg3: memref<2xf32, #tpu.memory_space<smem>>, %arg4: memref<4x4xf32, #tpu.memory_space<smem>>, %arg5: memref<2x4xf32, #tpu.memory_space<smem>>, %arg6: memref<1x4x2x128xf32, #tpu.memory_space<vmem>>, %arg7: memref<1x4x2x128xf32, #tpu.memory_space<vmem>>, %arg8: memref<1x4x2x128xf32, #tpu.memory_space<vmem>>, %arg9: memref<1x1x2x128xf32, #tpu.memory_space<vmem>>, %arg10: memref<1x4x2x128xf32, #tpu.memory_space<vmem>>) attributes {dimension_semantics = [#tpu.dimension_semantics<parallel>, #tpu.dimension_semantics<parallel>], iteration_bounds = array<i64: 2, 1>, scalar_prefetch = 0 : i64, scratch_operands = 0 : i64, tpu.core_type = #tpu.core_type<tc>, window_params = [{transform_indices = @transform_0, window_bounds = array<i64: 2>}, {transform_indices = @transform_1, window_bounds = array<i64: 2>}, {transform_indices = @transform_2, window_bounds = array<i64: 4, 4>}, {transform_indices = @transform_3, window_bounds = array<i64: 2, 4>}, {transform_indices = @transform_4, window_bounds = array<i64: 1, 4, 2, 128>}, {transform_indices = @transform_5, window_bounds = array<i64: 1, 4, 2, 128>}, {transform_indices = @transform_6, window_bounds = array<i64: 1, 4, 2, 128>}, {transform_indices = @transform_7, window_bounds = array<i64: 1, 1, 2, 128>}, {transform_indices = @transform_8, window_bounds = array<i64: 1, 4, 2, 128>}]} {
    %0 = arith.index_cast %arg0 : i32 to index
    %1 = memref.load %arg2[%0] : memref<2xf32, #tpu.memory_space<smem>>
    %2 = arith.index_cast %arg0 : i32 to index
    %3 = memref.load %arg3[%2] : memref<2xf32, #tpu.memory_space<smem>>
    %c0 = arith.constant 0 : index
    %c0_0 = arith.constant 0 : index
    %c0_1 = arith.constant 0 : index
    %c0_2 = arith.constant 0 : index
    %4 = vector.load %arg9[%c0, %c0_0, %c0_1, %c0_2] : memref<1x1x2x128xf32, #tpu.memory_space<vmem>>, vector<1x1x2x128xf32>
    %5 = vector.shape_cast %4 : vector<1x1x2x128xf32> to vector<2x128xf32>
    %c0_3 = arith.constant 0 : index
    %c0_4 = arith.constant 0 : index
    %c0_5 = arith.constant 0 : index
    %c0_6 = arith.constant 0 : index
    %6 = vector.load %arg8[%c0_3, %c0_4, %c0_5, %c0_6] : memref<1x4x2x128xf32, #tpu.memory_space<vmem>>, vector<1x1x2x128xf32>
    %7 = vector.shape_cast %6 : vector<1x1x2x128xf32> to vector<2x128xf32>
    %c0_7 = arith.constant 0 : index
    %c0_8 = arith.constant 0 : index
    %c0_9 = arith.constant 0 : index
    %c0_10 = arith.constant 0 : index
    %8 = vector.load %arg7[%c0_7, %c0_8, %c0_9, %c0_10] : memref<1x4x2x128xf32, #tpu.memory_space<vmem>>, vector<1x1x2x128xf32>
    %9 = vector.shape_cast %8 : vector<1x1x2x128xf32> to vector<2x128xf32>
    %10 = vector.broadcast %1 : f32 to vector<2x128xf32>
    %11 = arith.mulf %9, %10 : vector<2x128xf32>
    %12 = arith.addf %7, %11 : vector<2x128xf32>
    %c0_11 = arith.constant 0 : index
    %c0_12 = arith.constant 0 : index
    %c0_13 = arith.constant 0 : index
    %c0_14 = arith.constant 0 : index
    %13 = vector.load %arg6[%c0_11, %c0_12, %c0_13, %c0_14] : memref<1x4x2x128xf32, #tpu.memory_space<vmem>>, vector<1x1x2x128xf32>
    %14 = vector.shape_cast %13 : vector<1x1x2x128xf32> to vector<2x128xf32>
    %15 = arith.subf %14, %12 : vector<2x128xf32>
    %16 = arith.mulf %15, %5 : vector<2x128xf32>
    %17 = arith.addf %12, %16 : vector<2x128xf32>
    %c0_15 = arith.constant 0 : index
    %c1 = arith.constant 1 : index
    %c0_16 = arith.constant 0 : index
    %c0_17 = arith.constant 0 : index
    %18 = vector.load %arg8[%c0_15, %c1, %c0_16, %c0_17] : memref<1x4x2x128xf32, #tpu.memory_space<vmem>>, vector<1x1x2x128xf32>
    %19 = vector.shape_cast %18 : vector<1x1x2x128xf32> to vector<2x128xf32>
    %c0_18 = arith.constant 0 : index
    %c1_19 = arith.constant 1 : index
    %c0_20 = arith.constant 0 : index
    %c0_21 = arith.constant 0 : index
    %20 = vector.load %arg7[%c0_18, %c1_19, %c0_20, %c0_21] : memref<1x4x2x128xf32, #tpu.memory_space<vmem>>, vector<1x1x2x128xf32>
    %21 = vector.shape_cast %20 : vector<1x1x2x128xf32> to vector<2x128xf32>
    %22 = vector.broadcast %1 : f32 to vector<2x128xf32>
    %23 = arith.mulf %21, %22 : vector<2x128xf32>
    %24 = arith.addf %19, %23 : vector<2x128xf32>
    %c0_22 = arith.constant 0 : index
    %c1_23 = arith.constant 1 : index
    %c0_24 = arith.constant 0 : index
    %c0_25 = arith.constant 0 : index
    %25 = vector.load %arg6[%c0_22, %c1_23, %c0_24, %c0_25] : memref<1x4x2x128xf32, #tpu.memory_space<vmem>>, vector<1x1x2x128xf32>
    %26 = vector.shape_cast %25 : vector<1x1x2x128xf32> to vector<2x128xf32>
    %27 = arith.subf %26, %24 : vector<2x128xf32>
    %28 = arith.mulf %27, %5 : vector<2x128xf32>
    %29 = arith.addf %24, %28 : vector<2x128xf32>
    %c0_26 = arith.constant 0 : index
    %c2 = arith.constant 2 : index
    %c0_27 = arith.constant 0 : index
    %c0_28 = arith.constant 0 : index
    %30 = vector.load %arg8[%c0_26, %c2, %c0_27, %c0_28] : memref<1x4x2x128xf32, #tpu.memory_space<vmem>>, vector<1x1x2x128xf32>
    %31 = vector.shape_cast %30 : vector<1x1x2x128xf32> to vector<2x128xf32>
    %c0_29 = arith.constant 0 : index
    %c2_30 = arith.constant 2 : index
    %c0_31 = arith.constant 0 : index
    %c0_32 = arith.constant 0 : index
    %32 = vector.load %arg7[%c0_29, %c2_30, %c0_31, %c0_32] : memref<1x4x2x128xf32, #tpu.memory_space<vmem>>, vector<1x1x2x128xf32>
    %33 = vector.shape_cast %32 : vector<1x1x2x128xf32> to vector<2x128xf32>
    %34 = vector.broadcast %1 : f32 to vector<2x128xf32>
    %35 = arith.mulf %33, %34 : vector<2x128xf32>
    %36 = arith.addf %31, %35 : vector<2x128xf32>
    %c0_33 = arith.constant 0 : index
    %c2_34 = arith.constant 2 : index
    %c0_35 = arith.constant 0 : index
    %c0_36 = arith.constant 0 : index
    %37 = vector.load %arg6[%c0_33, %c2_34, %c0_35, %c0_36] : memref<1x4x2x128xf32, #tpu.memory_space<vmem>>, vector<1x1x2x128xf32>
    %38 = vector.shape_cast %37 : vector<1x1x2x128xf32> to vector<2x128xf32>
    %39 = arith.subf %38, %36 : vector<2x128xf32>
    %40 = arith.mulf %39, %5 : vector<2x128xf32>
    %41 = arith.addf %36, %40 : vector<2x128xf32>
    %c0_37 = arith.constant 0 : index
    %c3 = arith.constant 3 : index
    %c0_38 = arith.constant 0 : index
    %c0_39 = arith.constant 0 : index
    %42 = vector.load %arg8[%c0_37, %c3, %c0_38, %c0_39] : memref<1x4x2x128xf32, #tpu.memory_space<vmem>>, vector<1x1x2x128xf32>
    %43 = vector.shape_cast %42 : vector<1x1x2x128xf32> to vector<2x128xf32>
    %c0_40 = arith.constant 0 : index
    %c3_41 = arith.constant 3 : index
    %c0_42 = arith.constant 0 : index
    %c0_43 = arith.constant 0 : index
    %44 = vector.load %arg7[%c0_40, %c3_41, %c0_42, %c0_43] : memref<1x4x2x128xf32, #tpu.memory_space<vmem>>, vector<1x1x2x128xf32>
    %45 = vector.shape_cast %44 : vector<1x1x2x128xf32> to vector<2x128xf32>
    %46 = vector.broadcast %1 : f32 to vector<2x128xf32>
    %47 = arith.mulf %45, %46 : vector<2x128xf32>
    %48 = arith.addf %43, %47 : vector<2x128xf32>
    %c0_44 = arith.constant 0 : index
    %c3_45 = arith.constant 3 : index
    %c0_46 = arith.constant 0 : index
    %c0_47 = arith.constant 0 : index
    %49 = vector.load %arg6[%c0_44, %c3_45, %c0_46, %c0_47] : memref<1x4x2x128xf32, #tpu.memory_space<vmem>>, vector<1x1x2x128xf32>
    %50 = vector.shape_cast %49 : vector<1x1x2x128xf32> to vector<2x128xf32>
    %51 = arith.subf %50, %48 : vector<2x128xf32>
    %52 = arith.mulf %51, %5 : vector<2x128xf32>
    %53 = arith.addf %48, %52 : vector<2x128xf32>
    %c0_48 = arith.constant 0 : index
    %c0_49 = arith.constant 0 : index
    %54 = memref.load %arg4[%c0_48, %c0_49] : memref<4x4xf32, #tpu.memory_space<smem>>
    %55 = vector.broadcast %54 : f32 to vector<2x128xf32>
    %56 = arith.mulf %17, %55 : vector<2x128xf32>
    %c0_50 = arith.constant 0 : index
    %c1_51 = arith.constant 1 : index
    %57 = memref.load %arg4[%c0_50, %c1_51] : memref<4x4xf32, #tpu.memory_space<smem>>
    %58 = vector.broadcast %57 : f32 to vector<2x128xf32>
    %59 = arith.mulf %29, %58 : vector<2x128xf32>
    %60 = arith.addf %56, %59 : vector<2x128xf32>
    %c0_52 = arith.constant 0 : index
    %c2_53 = arith.constant 2 : index
    %61 = memref.load %arg4[%c0_52, %c2_53] : memref<4x4xf32, #tpu.memory_space<smem>>
    %62 = vector.broadcast %61 : f32 to vector<2x128xf32>
    %63 = arith.mulf %41, %62 : vector<2x128xf32>
    %64 = arith.addf %60, %63 : vector<2x128xf32>
    %c0_54 = arith.constant 0 : index
    %c3_55 = arith.constant 3 : index
    %65 = memref.load %arg4[%c0_54, %c3_55] : memref<4x4xf32, #tpu.memory_space<smem>>
    %66 = vector.broadcast %65 : f32 to vector<2x128xf32>
    %67 = arith.mulf %53, %66 : vector<2x128xf32>
    %68 = arith.addf %64, %67 : vector<2x128xf32>
    %69 = vector.broadcast %3 : f32 to vector<2x128xf32>
    %70 = arith.mulf %68, %69 : vector<2x128xf32>
    %71 = arith.index_cast %arg0 : i32 to index
    %c0_56 = arith.constant 0 : index
    %72 = memref.load %arg5[%71, %c0_56] : memref<2x4xf32, #tpu.memory_space<smem>>
    %73 = vector.broadcast %72 : f32 to vector<2x128xf32>
    %74 = arith.addf %70, %73 : vector<2x128xf32>
    %c0_57 = arith.constant 0 : index
    %c0_58 = arith.constant 0 : index
    %c0_59 = arith.constant 0 : index
    %c0_60 = arith.constant 0 : index
    %75 = vector.load %arg8[%c0_57, %c0_58, %c0_59, %c0_60] : memref<1x4x2x128xf32, #tpu.memory_space<vmem>>, vector<1x1x2x128xf32>
    %76 = vector.shape_cast %75 : vector<1x1x2x128xf32> to vector<2x128xf32>
    %77 = arith.subf %74, %76 : vector<2x128xf32>
    %78 = arith.mulf %77, %5 : vector<2x128xf32>
    %79 = arith.addf %76, %78 : vector<2x128xf32>
    %c0_61 = arith.constant 0 : index
    %c0_62 = arith.constant 0 : index
    %c0_63 = arith.constant 0 : index
    %c0_64 = arith.constant 0 : index
    %80 = vector.load %arg10[%c0_61, %c0_62, %c0_63, %c0_64] : memref<1x4x2x128xf32, #tpu.memory_space<vmem>>, vector<1x1x2x128xf32>
    %81 = vector.shape_cast %80 : vector<1x1x2x128xf32> to vector<2x128xf32>
    %82 = vector.shape_cast %79 : vector<2x128xf32> to vector<1x1x2x128xf32>
    tpu.vector_store %arg10[%c0_61, %c0_62, %c0_63, %c0_64], %82 {strides = array<i32>} : memref<1x4x2x128xf32, #tpu.memory_space<vmem>>, vector<1x1x2x128xf32>,
    %c1_65 = arith.constant 1 : index
    %c0_66 = arith.constant 0 : index
    %83 = memref.load %arg4[%c1_65, %c0_66] : memref<4x4xf32, #tpu.memory_space<smem>>
    %84 = vector.broadcast %83 : f32 to vector<2x128xf32>
    %85 = arith.mulf %17, %84 : vector<2x128xf32>
    %c1_67 = arith.constant 1 : index
    %c1_68 = arith.constant 1 : index
    %86 = memref.load %arg4[%c1_67, %c1_68] : memref<4x4xf32, #tpu.memory_space<smem>>
    %87 = vector.broadcast %86 : f32 to vector<2x128xf32>
    %88 = arith.mulf %29, %87 : vector<2x128xf32>
    %89 = arith.addf %85, %88 : vector<2x128xf32>
    %c1_69 = arith.constant 1 : index
    %c2_70 = arith.constant 2 : index
    %90 = memref.load %arg4[%c1_69, %c2_70] : memref<4x4xf32, #tpu.memory_space<smem>>
    %91 = vector.broadcast %90 : f32 to vector<2x128xf32>
    %92 = arith.mulf %41, %91 : vector<2x128xf32>
    %93 = arith.addf %89, %92 : vector<2x128xf32>
    %c1_71 = arith.constant 1 : index
    %c3_72 = arith.constant 3 : index
    %94 = memref.load %arg4[%c1_71, %c3_72] : memref<4x4xf32, #tpu.memory_space<smem>>
    %95 = vector.broadcast %94 : f32 to vector<2x128xf32>
    %96 = arith.mulf %53, %95 : vector<2x128xf32>
    %97 = arith.addf %93, %96 : vector<2x128xf32>
    %98 = vector.broadcast %3 : f32 to vector<2x128xf32>
    %99 = arith.mulf %97, %98 : vector<2x128xf32>
    %100 = arith.index_cast %arg0 : i32 to index
    %c1_73 = arith.constant 1 : index
    %101 = memref.load %arg5[%100, %c1_73] : memref<2x4xf32, #tpu.memory_space<smem>>
    %102 = vector.broadcast %101 : f32 to vector<2x128xf32>
    %103 = arith.addf %99, %102 : vector<2x128xf32>
    %c0_74 = arith.constant 0 : index
    %c1_75 = arith.constant 1 : index
    %c0_76 = arith.constant 0 : index
    %c0_77 = arith.constant 0 : index
    %104 = vector.load %arg8[%c0_74, %c1_75, %c0_76, %c0_77] : memref<1x4x2x128xf32, #tpu.memory_space<vmem>>, vector<1x1x2x128xf32>
    %105 = vector.shape_cast %104 : vector<1x1x2x128xf32> to vector<2x128xf32>
    %106 = arith.subf %103, %105 : vector<2x128xf32>
    %107 = arith.mulf %106, %5 : vector<2x128xf32>
    %108 = arith.addf %105, %107 : vector<2x128xf32>
    %c0_78 = arith.constant 0 : index
    %c1_79 = arith.constant 1 : index
    %c0_80 = arith.constant 0 : index
    %c0_81 = arith.constant 0 : index
    %109 = vector.load %arg10[%c0_78, %c1_79, %c0_80, %c0_81] : memref<1x4x2x128xf32, #tpu.memory_space<vmem>>, vector<1x1x2x128xf32>
    %110 = vector.shape_cast %109 : vector<1x1x2x128xf32> to vector<2x128xf32>
    %111 = vector.shape_cast %108 : vector<2x128xf32> to vector<1x1x2x128xf32>
    tpu.vector_store %arg10[%c0_78, %c1_79, %c0_80, %c0_81], %111 {strides = array<i32>} : memref<1x4x2x128xf32, #tpu.memory_space<vmem>>, vector<1x1x2x128xf32>,
    %c2_82 = arith.constant 2 : index
    %c0_83 = arith.constant 0 : index
    %112 = memref.load %arg4[%c2_82, %c0_83] : memref<4x4xf32, #tpu.memory_space<smem>>
    %113 = vector.broadcast %112 : f32 to vector<2x128xf32>
    %114 = arith.mulf %17, %113 : vector<2x128xf32>
    %c2_84 = arith.constant 2 : index
    %c1_85 = arith.constant 1 : index
    %115 = memref.load %arg4[%c2_84, %c1_85] : memref<4x4xf32, #tpu.memory_space<smem>>
    %116 = vector.broadcast %115 : f32 to vector<2x128xf32>
    %117 = arith.mulf %29, %116 : vector<2x128xf32>
    %118 = arith.addf %114, %117 : vector<2x128xf32>
    %c2_86 = arith.constant 2 : index
    %c2_87 = arith.constant 2 : index
    %119 = memref.load %arg4[%c2_86, %c2_87] : memref<4x4xf32, #tpu.memory_space<smem>>
    %120 = vector.broadcast %119 : f32 to vector<2x128xf32>
    %121 = arith.mulf %41, %120 : vector<2x128xf32>
    %122 = arith.addf %118, %121 : vector<2x128xf32>
    %c2_88 = arith.constant 2 : index
    %c3_89 = arith.constant 3 : index
    %123 = memref.load %arg4[%c2_88, %c3_89] : memref<4x4xf32, #tpu.memory_space<smem>>
    %124 = vector.broadcast %123 : f32 to vector<2x128xf32>
    %125 = arith.mulf %53, %124 : vector<2x128xf32>
    %126 = arith.addf %122, %125 : vector<2x128xf32>
    %127 = vector.broadcast %3 : f32 to vector<2x128xf32>
    %128 = arith.mulf %126, %127 : vector<2x128xf32>
    %129 = arith.index_cast %arg0 : i32 to index
    %c2_90 = arith.constant 2 : index
    %130 = memref.load %arg5[%129, %c2_90] : memref<2x4xf32, #tpu.memory_space<smem>>
    %131 = vector.broadcast %130 : f32 to vector<2x128xf32>
    %132 = arith.addf %128, %131 : vector<2x128xf32>
    %c0_91 = arith.constant 0 : index
    %c2_92 = arith.constant 2 : index
    %c0_93 = arith.constant 0 : index
    %c0_94 = arith.constant 0 : index
    %133 = vector.load %arg8[%c0_91, %c2_92, %c0_93, %c0_94] : memref<1x4x2x128xf32, #tpu.memory_space<vmem>>, vector<1x1x2x128xf32>
    %134 = vector.shape_cast %133 : vector<1x1x2x128xf32> to vector<2x128xf32>
    %135 = arith.subf %132, %134 : vector<2x128xf32>
    %136 = arith.mulf %135, %5 : vector<2x128xf32>
    %137 = arith.addf %134, %136 : vector<2x128xf32>
    %c0_95 = arith.constant 0 : index
    %c2_96 = arith.constant 2 : index
    %c0_97 = arith.constant 0 : index
    %c0_98 = arith.constant 0 : index
    %138 = vector.load %arg10[%c0_95, %c2_96, %c0_97, %c0_98] : memref<1x4x2x128xf32, #tpu.memory_space<vmem>>, vector<1x1x2x128xf32>
    %139 = vector.shape_cast %138 : vector<1x1x2x128xf32> to vector<2x128xf32>
    %140 = vector.shape_cast %137 : vector<2x128xf32> to vector<1x1x2x128xf32>
    tpu.vector_store %arg10[%c0_95, %c2_96, %c0_97, %c0_98], %140 {strides = array<i32>} : memref<1x4x2x128xf32, #tpu.memory_space<vmem>>, vector<1x1x2x128xf32>,
    %c3_99 = arith.constant 3 : index
    %c0_100 = arith.constant 0 : index
    %141 = memref.load %arg4[%c3_99, %c0_100] : memref<4x4xf32, #tpu.memory_space<smem>>
    %142 = vector.broadcast %141 : f32 to vector<2x128xf32>
    %143 = arith.mulf %17, %142 : vector<2x128xf32>
    %c3_101 = arith.constant 3 : index
    %c1_102 = arith.constant 1 : index
    %144 = memref.load %arg4[%c3_101, %c1_102] : memref<4x4xf32, #tpu.memory_space<smem>>
    %145 = vector.broadcast %144 : f32 to vector<2x128xf32>
    %146 = arith.mulf %29, %145 : vector<2x128xf32>
    %147 = arith.addf %143, %146 : vector<2x128xf32>
    %c3_103 = arith.constant 3 : index
    %c2_104 = arith.constant 2 : index
    %148 = memref.load %arg4[%c3_103, %c2_104] : memref<4x4xf32, #tpu.memory_space<smem>>
    %149 = vector.broadcast %148 : f32 to vector<2x128xf32>
    %150 = arith.mulf %41, %149 : vector<2x128xf32>
    %151 = arith.addf %147, %150 : vector<2x128xf32>
    %c3_105 = arith.constant 3 : index
    %c3_106 = arith.constant 3 : index
    %152 = memref.load %arg4[%c3_105, %c3_106] : memref<4x4xf32, #tpu.memory_space<smem>>
    %153 = vector.broadcast %152 : f32 to vector<2x128xf32>
    %154 = arith.mulf %53, %153 : vector<2x128xf32>
    %155 = arith.addf %151, %154 : vector<2x128xf32>
    %156 = vector.broadcast %3 : f32 to vector<2x128xf32>
    %157 = arith.mulf %155, %156 : vector<2x128xf32>
    %158 = arith.index_cast %arg0 : i32 to index
    %c3_107 = arith.constant 3 : index
    %159 = memref.load %arg5[%158, %c3_107] : memref<2x4xf32, #tpu.memory_space<smem>>
    %160 = vector.broadcast %159 : f32 to vector<2x128xf32>
    %161 = arith.addf %157, %160 : vector<2x128xf32>
    %c0_108 = arith.constant 0 : index
    %c3_109 = arith.constant 3 : index
    %c0_110 = arith.constant 0 : index
    %c0_111 = arith.constant 0 : index
    %162 = vector.load %arg8[%c0_108, %c3_109, %c0_110, %c0_111] : memref<1x4x2x128xf32, #tpu.memory_space<vmem>>, vector<1x1x2x128xf32>
    %163 = vector.shape_cast %162 : vector<1x1x2x128xf32> to vector<2x128xf32>
    %164 = arith.subf %161, %163 : vector<2x128xf32>
    %165 = arith.mulf %164, %5 : vector<2x128xf32>
    %166 = arith.addf %163, %165 : vector<2x128xf32>
    %c0_112 = arith.constant 0 : index
    %c3_113 = arith.constant 3 : index
    %c0_114 = arith.constant 0 : index
    %c0_115 = arith.constant 0 : index
    %167 = vector.load %arg10[%c0_112, %c3_113, %c0_114, %c0_115] : memref<1x4x2x128xf32, #tpu.memory_space<vmem>>, vector<1x1x2x128xf32>
    %168 = vector.shape_cast %167 : vector<1x1x2x128xf32> to vector<2x128xf32>
    %169 = vector.shape_cast %166 : vector<2x128xf32> to vector<1x1x2x128xf32>
    tpu.vector_store %arg10[%c0_112, %c3_113, %c0_114, %c0_115], %169 {strides = array<i32>} : memref<1x4x2x128xf32, #tpu.memory_space<vmem>>, vector<1x1x2x128xf32>,
    return
  }
  func.func @transform_0(%arg0: i32, %arg1: i32) -> i32 {
    %c0_i32 = arith.constant 0 : i32
    %c0_i32_0 = arith.constant 0 : i32
    return %c0_i32 : i32
  }
  func.func @transform_1(%arg0: i32, %arg1: i32) -> i32 {
    %c0_i32 = arith.constant 0 : i32
    %c0_i32_0 = arith.constant 0 : i32
    return %c0_i32 : i32
  }
  func.func @transform_2(%arg0: i32, %arg1: i32) -> (i32, i32) {
    %c0_i32 = arith.constant 0 : i32
    %c0_i32_0 = arith.constant 0 : i32
    %c0_i32_1 = arith.constant 0 : i32
    return %c0_i32, %c0_i32_0 : i32, i32
  }
  func.func @transform_3(%arg0: i32, %arg1: i32) -> (i32, i32) {
    %c0_i32 = arith.constant 0 : i32
    %c0_i32_0 = arith.constant 0 : i32
    %c0_i32_1 = arith.constant 0 : i32
    return %c0_i32, %c0_i32_0 : i32, i32
  }
  func.func @transform_4(%arg0: i32, %arg1: i32) -> (i32, i32, i32, i32) {
    %c0_i32 = arith.constant 0 : i32
    %c0_i32_0 = arith.constant 0 : i32
    %c0_i32_1 = arith.constant 0 : i32
    return %arg0, %c0_i32, %arg1, %c0_i32_0 : i32, i32, i32, i32
  }
  func.func @transform_5(%arg0: i32, %arg1: i32) -> (i32, i32, i32, i32) {
    %c0_i32 = arith.constant 0 : i32
    %c0_i32_0 = arith.constant 0 : i32
    %c0_i32_1 = arith.constant 0 : i32
    return %arg0, %c0_i32, %arg1, %c0_i32_0 : i32, i32, i32, i32
  }
  func.func @transform_6(%arg0: i32, %arg1: i32) -> (i32, i32, i32, i32) {
    %c0_i32 = arith.constant 0 : i32
    %c0_i32_0 = arith.constant 0 : i32
    %c0_i32_1 = arith.constant 0 : i32
    return %arg0, %c0_i32, %arg1, %c0_i32_0 : i32, i32, i32, i32
  }
  func.func @transform_7(%arg0: i32, %arg1: i32) -> (i32, i32, i32, i32) {
    %c0_i32 = arith.constant 0 : i32
    %c0_i32_0 = arith.constant 0 : i32
    %c0_i32_1 = arith.constant 0 : i32
    return %arg0, %c0_i32, %arg1, %c0_i32_0 : i32, i32, i32, i32
  }
  func.func @transform_8(%arg0: i32, %arg1: i32) -> (i32, i32, i32, i32) {
    %c0_i32 = arith.constant 0 : i32
    %c0_i32_0 = arith.constant 0 : i32
    %c0_i32_1 = arith.constant 0 : i32
    return %arg0, %c0_i32, %arg1, %c0_i32_0 : i32, i32, i32, i32
  }
}

</mosaic_0001>

<bundles_post_ra>
// kernel: tpu_custom_call.1
= control target key start
LH: loop header
LB: loop body
LE: loop exit
PB: predicated region body
PF: predicated region fallthrough
CT: control target
= control target key end

     0   :  { %s1661_s0 = inlined_call_operand.hbm [shape: f32[2], index: 0, kind: input, shape index: {}]   ;;  %s1662_s1 = inlined_call_operand.hbm [shape: f32[2], index: 1, kind: input, shape index: {}]   ;;  %s1663_s2 = inlined_call_operand.hbm [shape: f32[4,4], index: 2, kind: input, shape index: {}]   ;;  %s1664_s3 = inlined_call_operand.vmem [shape: f32[2,4], index: 3, kind: input, shape index: {}]   ;;  %s1665_s4 = inlined_call_operand.hbm [shape: f32[2,4,2,128], index: 4, kind: input, shape index: {}]   ;;  %s1666_s5 = inlined_call_operand.hbm [shape: f32[2,4,2,128], index: 5, kind: input, shape index: {}]   ;;  %s1667_s6 = inlined_call_operand.hbm [shape: f32[2,4,2,128], index: 6, kind: input, shape index: {}]   ;;  %s1668_s7 = inlined_call_operand.vmem [shape: f32[2,1,2,128], index: 7, kind: input, shape index: {}]   ;;  %s1669_s8 = inlined_call_operand.hbm [shape: f32[2,4,2,128], index: 8, kind: output, shape index: {}]  }
   0x1   :  { %1681 = sst [smem:[#allocation28_spill]] %s1661_s0 }
   0x2   :  { %1682 = sst [smem:[#allocation29_spill]] %s1662_s1 }
   0x3   :  { %1683 = sst [smem:[#allocation30_spill]] %s1663_s2 }
   0x4   :  { %1684 = sst [smem:[#allocation31_spill]] %s1666_s5 }
   0x5   :  { %13 = vsyncpa [#allocation5], 0 }
   0x6   :  { %14 = vsyncpa [#allocation8], 0 }
   0x7   :  { %15 = vsyncpa [#allocation6], 0 }
   0x8   :  { %16 = vsyncpa [#allocation3], 0 }
   0x9   :  { %18 = vsyncpa [#allocation3 + $0x1], 0 }
   0xa   :  { %19 = vsyncpa [#allocation13], 0 }
   0xb   :  { %21 = vsyncpa [#allocation13 + $0x1], 0 }
   0xc   :  { %22 = vsyncpa [#allocation4], 0 }
   0xd   :  { %24 = vsyncpa [#allocation4 + $0x1], 0  ;;  %s1352_s27 = smov 0   ;;  %s1354_s28 = smov 0  }
   0xe   :  { %s1356_s29 = smov 0   ;;  %s1358_s30 = smov 0  }
   0xf   :  { %s1360_s9 = smov 0   ;;  %s1362_s10 = smov 0  }
  0x10 LB: > { %1685 = sst [smem:[#allocation22_spill]] %s1277_s27  ;;  %s1383_s11 = sadd.s32 4294967295, %s1297_s10   ;;  %s1297_s10 = sphi %s1362_s10, %s30_s10   ;;  %s1293_s9 = sphi %s1360_s9, %s1713_s9   ;;  %s1289_s30 = sphi %s1358_s30, %s1708_s30   ;;  %s1285_s29 = sphi %s1356_s29, %s1712_s29   ;;  %s1281_s28 = sphi %s1354_s28, %s1711_s28   ;;  %s1277_s27 = sphi %s1352_s27, %s1710_s27  }
  0x11   : > { %1686 = sst [smem:[#allocation23_spill]] %s1293_s9  ;;  %s866_s12 = sadd.s32 4294967294, %s1297_s10  }
  0x12   : > { %1687 = sst [smem:[#allocation24_spill]] %s1297_s10  ;;  %p148_p0 = scmp.ne.s32.totalorder %s1281_s28, %s1277_s27 }
  0x13   : > { %p149_p1 = scmp.eq.s32.totalorder %s1383_s11, 0  ;;  %p258_p2 = scmp.eq.s32.totalorder %s1383_s11, 1 }
  0x14   : > { %p264_p3 = scmp.eq.s32.totalorder %s866_s12, 1  ;;  %p867_p5 = scmp.ge.s32.totalorder %s1297_s10, 1 }
  0x15   : > { %p1392_p4 = por %p149_p1, %p148_p0  ;;  %p271_p7 = scmp.lt.s32.totalorder %s1297_s10, 3 }
  0x16   : > { %p1397_p6 = por %p264_p3, %p148_p0  ;;  %s1691_s1 = sld [smem:[#allocation29_spill]] }
  0x17   : > { %p1405_p8 = pnand %p867_p5, %p271_p7  ;;  %p872_p9 = scmp.ge.s32.totalorder %s1297_s10, 2 }
  0x18   : > { %s1689_s14 = scalar_select %p1397_p6, 1, 0 }
  0x19   : > { %p956_p10 = pneg %p1405_p8  ;;  %s42_s20 = sadd.s32 1, %s1293_s9 }
  0x1a   : > { %1690 = sst [smem:[#allocation25_spill]] %s1689_s14  ;;  %s135_s21 = sadd.s32 1, %s1285_s29 }
  0x1b   : > { %p1414_p11 = pnand %p956_p10, %p149_p1  ;;  %p44_p12 = scmp.ge.s32.totalorder %s42_s20, 2 }
  0x1c   : > { %s293_s17 = sshll.u32 %s1691_s1, 4  ;;  %s1299_s22 = smov [#allocation7]   ;;  %s294_s17 = int_to_ptr.hbm [resolvable:$true] %s293_s17 }
  0x1d   : > { %962 = dma.hbm_to_smem (!%p1414_p11), %s294_s17, 16, %s1299_s22, [#allocation8]  }
  0x1e   : > { %s1715_s20 = smov (%p44_p12, %s42_s20), 0  ;;  %p142_p13 = scmp.ne.s32.totalorder %s1285_s29, %s1281_s28 }
  0x1f   : > { %1694 = sst [smem:[#allocation26_spill]] %s1715_s20  ;;  %p143_p0 = scmp.eq.s32.totalorder %s1297_s10, 0 }
  0x20   : > { %s130_s23 = ssub.s32 %s1293_s9, %s1715_s20  ;;  %p987_p3 = scmp.lt.s32.totalorder %s1297_s10, 2 }
  0x21   : > { %p133_p5 = scmp.eq.s32.totalorder %s130_s23, 0  ;;  %p144_p7 = por %p143_p0, %p142_p13 }
  0x22   : > { %p1432_p10 = por %p258_p2, %p142_p13  ;;  %s1671_s25 = sand.u32 1, %s1285_s29  }
  0x23   : > { %s1438_s26 = scalar_select %p133_p5, %s1285_s29, %s135_s21  }
  0x24   : > { %s1442_s12 = sshll.u32 %s1671_s25, 3  ;;  %s1445_s15 = sshll.u32 %s1293_s9, 3 }
  0x25   : > { %1696 = sst [smem:[#allocation27_spill]] %s1438_s26  ;;  %p1447_p12 = pnand %p987_p3, %p144_p7 }
  0x26   : > { %s347_s17 = sand.u32 1, %s1297_s10   ;;  %s1698_s5 = sld [smem:[#allocation31_spill]] }
  0x27   : > { %s351_s20 = scalar_lea.vmem [#allocation12], %s1442_s12  ;;  %s1457_s9 = scalar_lea.sflag [#allocation13], %s347_s17 }
  0x28   : > { %s360_s25 = sshll.u32 %s351_s20, 4  ;;  %s1677_s26 = smov 32   ;;  %s361_s25 = int_to_ptr.vmem [resolvable:$true] %s360_s25 }
  0x29   : > { %s1679_s14 = smov 2   ;;  %s1699_s0 = sld [smem:[#allocation28_spill]] }
  0x2a   : > { %s1700_s2 = sld [smem:[#allocation30_spill]]  ;;  %s1302_s10 = smov [#allocation2]  }
  0x2b   : > { %s1303_s27 = smov [#allocation9]   ;;  %s313_s22 = sshll.u32 %s1664_s3, 4  ;;  %s314_s22 = int_to_ptr.vmem [resolvable:$true] %s313_s22 }
  0x2c   : > { %s357_s1 = scalar_lea.hbm %s1698_s5, %s1445_s15 }
  0x2d   : > { %s358_s21 = sshll.u32 %s357_s1, 4  ;;  %s1304_s1 = smov [#allocation10]   ;;  %s359_s21 = int_to_ptr.hbm [resolvable:$true] %s358_s21 }
  0x2e   : > { %975 = dma.hbm_to_vmem [thread:$0]  (!%p1447_p12), %s359_s21, 128, %s361_s25, %s1457_s9, %s1677_s26, %s1677_s26, %s1679_s14  }
  0x2f   : > { %s283_s23 = sshll.u32 %s1699_s0, 4  ;;  %s328_s26 = scalar_lea.vmem [#allocation11], %s1442_s12  ;;  %s284_s23 = int_to_ptr.hbm [resolvable:$true] %s283_s23 }
  0x30   : > { %s303_s17 = sshll.u32 %s1700_s2, 4  ;;  %s337_s14 = sshll.u32 %s328_s26, 4  ;;  %s304_s17 = int_to_ptr.hbm [resolvable:$true] %s303_s17  ;;  %s338_s14 = int_to_ptr.vmem [resolvable:$true] %s337_s14 }
  0x31   : > { %959 = dma.hbm_to_smem (!%p1414_p11), %s284_s23, 16, %s1302_s10, [#allocation5]  }
  0x32   : > { %965 = dma.hbm_to_smem (!%p1414_p11), %s304_s17, 64, %s1303_s27, [#allocation8]  }
  0x33   : > { %968 = dma.vmem_to_smem (!%p1414_p11), %s314_s22, 32, %s1304_s1, [#allocation6]  }
  0x34   : > { %s334_s10 = scalar_lea.hbm %s1665_s4, %s1445_s15  ;;  %s1701_s27 = sand.u32 1, %s1285_s29  }
  0x35   : > { %s335_s23 = sshll.u32 %s334_s10, 4  ;;  %s325_s17 = scalar_lea.sflag [#allocation3], %s1701_s27  ;;  %s336_s23 = int_to_ptr.hbm [resolvable:$true] %s335_s23 }
  0x36   : > { %s1702_s25 = smov 2   ;;  %s1703_s21 = smov 32  }
  0x37   : > { %972 = dma.hbm_to_vmem [thread:$0]  (!%p1447_p12), %s336_s23, 128, %s338_s14, %s325_s17, %s1703_s21, %s1703_s21, %s1702_s25  }
  0x38   : > { %s380_s22 = scalar_lea.hbm %s1667_s6, %s1445_s15  ;;  %s374_s2 = scalar_lea.vmem [#allocation14], %s1442_s12 }
  0x39   : > { %s381_s1 = sshll.u32 %s380_s22, 4  ;;  %s383_s5 = sshll.u32 %s374_s2, 4  ;;  %s382_s1 = int_to_ptr.hbm [resolvable:$true] %s381_s1  ;;  %s384_s5 = int_to_ptr.vmem [resolvable:$true] %s383_s5 }
  0x3a   : > { %978 = dma.hbm_to_vmem [thread:$0]  (!%p1447_p12), %s382_s1, 128, %s384_s5, %s1457_s9, %s1703_s21, %s1703_s21, %s1702_s25  }
  0x3b   : > { %405 = sbr.rel (%p1405_p8) target bundleno = 126 (0x7e), region = 52 }
  0x40   : > { %1252 = dma.done.wait (%p149_p1), [#allocation5], 16  }
  0x41   : > { %1254 = vsyncadd (%p149_p1), [#allocation5], 4294967280 }
  0x42   : > { %1256 = dma.done.wait (%p149_p1), [#allocation8], 80  }
  0x43   : > { %1258 = vsyncadd (%p149_p1), [#allocation8], 4294967216 }
  0x44   : > { %1260 = dma.done.wait (%p149_p1), [#allocation6], 32  }
  0x45   : > { %1262 = vsyncadd (%p149_p1), [#allocation6], 4294967264  ;;  %s1518_s0 = sand.u32 1, %s1281_s28  }
  0x46   : > { %s1521_s2 = sshll.u32 %s1518_s0, 3  ;;  %s428_s9 = scalar_lea.sflag [#allocation3], %s1518_s0 }
  0x47   : > { %s1525_s14 = scalar_lea.vmem [#allocation11], %s1521_s2 }
  0x48   : > { %1264 = dma.done.wait (%p1392_p4), %s428_s9, 128  }
  0x49   : > { %1266 = vsyncadd (%p1392_p4), %s428_s9, 4294967168  ;;  %s437_s18 = sand.u32 1, %s1383_s11   ;;  %s441_s12 = scalar_lea.vmem [#allocation12], %s1521_s2 }
  0x4a   : > { %s438_s26 = scalar_lea.sflag [#allocation13], %s437_s18 }
  0x4b   : > { %1268 = dma.done.wait (%p1392_p4), %s438_s26, 256  }
  0x4c   : > { %1270 = vsyncadd (%p1392_p4), %s438_s26, 4294967040  ;;  %s1538_s15 = scalar_lea.vmem [#allocation14], %s1521_s2 }
  0x4d   : > { %457 = sfence }
  0x4e   : > { %p503_p1 = scmp.lt.s32.totalorder %s1289_s30, 1  ;;  %s510_s11 = sld [smem:[#allocation2 + %s1289_s30]]  ;;  %v514_v0 = vld [vmem:[%s441_s12] sm:$0x3]  ;;  %v893_v1 = vld [vmem:[%s441_s12 + $0x2] sm:$0x3] }
  0x4f   : > { %s1543_s16 = sshll.u32 %s1289_s30, 7  ;;  %s1547_s20 = sld [smem:[#allocation7 + %s1289_s30]]  ;;  %v896_v2 = vld [vmem:[%s441_s12 + $0x4] sm:$0x3]  ;;  %v899_v3 = vld [vmem:[%s441_s12 + $0x6] sm:$0x3] }
  0x50   : > { %s504_s13 = scalar_select %p503_p1, %s1289_s30, 1  ;;  %v1555_v4 = vld [vmem:[%s1538_s15] sm:$0x3]  ;;  %v892_v5 = vld [vmem:[%s1538_s15 + $0x2] sm:$0x3] }
  0x51   : > { %s1550_s10 = sld [smem:[#allocation10 + %s1543_s16]]  ;;  %v895_v7 = vld [vmem:[%s1538_s15 + $0x4] sm:$0x3]  ;;  %v898_v8 = vld [vmem:[%s1538_s15 + $0x6] sm:$0x3]  ;;  %s596_s18 = sadd.s32 1, %s1543_s16 }
  0x52   : > { %s891_s23 = sshll.u32 %s504_s13, 1  ;;  %s1552_s27 = sld [smem:[#allocation9]]  ;;  %v518_v10 = vld [vmem:[%s1525_s14] sm:$0x3]  ;;  %v894_v12 = vld [vmem:[%s1525_s14 + $0x2] sm:$0x3] }
  0x53   : > { %s1558_s17 = sld [smem:[#allocation9 + $0x1]]  ;;  %s509_s22 = scalar_lea.vmem %s1668_s7, %s891_s23  ;;  %v897_v15 = vld [vmem:[%s1525_s14 + $0x4] sm:$0x3]  ;;  %v900_v16 = vld [vmem:[%s1525_s14 + $0x6] sm:$0x3] }
  0x54   : > { %v515_v6 = vstv %s510_s11  ;;  %s1562_s25 = sld [smem:[#allocation9 + $0x2]]  ;;  %v1579_v21 = vld [vmem:[%s509_s22] sm:$0x3]  ;;  %s622_s23 = sadd.s32 2, %s1543_s16 }
  0x55   : > { %v516_v9 = vmul.f32 %v515_v6, %v514_v0  ;;  %v526_v11 = vmul.f32 %v893_v1, %v515_v6  ;;  %v537_v13 = vmul.f32 %v896_v2, %v515_v6  ;;  %v548_v14 = vmul.f32 %v899_v3, %v515_v6  ;;  %s1569_s1 = sld [smem:[#allocation9 + $0x3]] }
  0x56   : > { %s1573_s5 = sld [smem:[#allocation9 + $0x80]]  ;;  %v570_v58 = vstv %s1547_s20  ;;  %s502_s20 = scalar_lea.vmem [#allocation15], %s1521_s2 }
  0x57   : > { %v517_v17 = vadd.f32 %v516_v9, %v1555_v4  ;;  %v527_v18 = vadd.f32 %v892_v5, %v526_v11  ;;  %v538_v19 = vadd.f32 %v895_v7, %v537_v13  ;;  %v549_v20 = vadd.f32 %v898_v8, %v548_v14  ;;  %s1576_s9 = sld [smem:[#allocation9 + $0x81]]  ;;  %v909_v14 = vld [vmem:[%s1538_s15 + $0x2] sm:$0x3]  ;;  %s659_s2 = scalar_lea.sflag [#allocation4], %s1518_s0 }
  0x58   : > { %s1581_s26 = sld [smem:[#allocation9 + $0x82]]  ;;  %v556_v30 = vstv %s1552_s27  ;;  %v574_v1 = vstv %s1550_s10 }
  0x59   : > { %v519_v22 = vsub.f32 %v518_v10, %v517_v17  ;;  %v530_v23 = vsub.f32 %v894_v12, %v527_v18  ;;  %v541_v24 = vsub.f32 %v897_v15, %v538_v19  ;;  %v552_v25 = vsub.f32 %v900_v16, %v549_v20  ;;  %s1583_s14 = sld [smem:[#allocation9 + $0x83]] }
  0x5a   : > { %s1585_s12 = sld [smem:[#allocation10 + %s596_s18]]  ;;  %v559_v31 = vstv %s1558_s17  ;;  %v563_v32 = vstv %s1562_s25 }
  0x5b   : > { %v520_v26 = vmul.f32 %v519_v22, %v1579_v21  ;;  %v531_v27 = vmul.f32 %v530_v23, %v1579_v21  ;;  %v542_v28 = vmul.f32 %v541_v24, %v1579_v21  ;;  %v553_v29 = vmul.f32 %v552_v25, %v1579_v21  ;;  %s1591_s11 = sld [smem:[#allocation9 + $0x100]] }
  0x5c   : > { %v581_v33 = vstv %s1573_s5  ;;  %s912_s13 = sld [smem:[#allocation9 + $0x101]]  ;;  %v567_v38 = vstv %s1569_s1  ;;  %s648_s5 = sadd.s32 3, %s1543_s16 }
  0x5d   : > { %v521_v34 = vadd.f32 %v520_v26, %v517_v17  ;;  %v532_v35 = vadd.f32 %v531_v27, %v527_v18  ;;  %v543_v36 = vadd.f32 %v542_v28, %v538_v19  ;;  %v554_v37 = vadd.f32 %v553_v29, %v549_v20  ;;  %s913_s21 = sld [smem:[#allocation9 + $0x102]]  ;;  %v915_v26 = vld [vmem:[%s1538_s15 + $0x4] sm:$0x3]  ;;  %s931_s16 = sshll.u32 %s1289_s30, 3 }
  0x5e   : > { %v584_v39 = vstv %s1576_s9  ;;  %v588_v40 = vstv %s1581_s26  ;;  %s914_s19 = sld [smem:[#allocation9 + $0x103]]  ;;  %s671_s26 = scalar_lea.hbm %s1669_s8, %s931_s16 }
  0x5f   : > { %v557_v41 = vmul.f32 %v556_v30, %v521_v34  ;;  %v560_v42 = vmul.f32 %v559_v31, %v532_v35  ;;  %v564_v43 = vmul.f32 %v563_v32, %v543_v36  ;;  %s1601_s27 = sld [smem:[#allocation10 + %s622_s23]]  ;;  %v582_v44 = vmul.f32 %v581_v33, %v521_v34  ;;  %s672_s30 = sshll.u32 %s502_s20, 4  ;;  %s673_s30 = int_to_ptr.vmem [resolvable:$true] %s672_s30 }
  0x60   : > { %v585_v45 = vmul.f32 %v584_v39, %v532_v35  ;;  %v589_v46 = vmul.f32 %v588_v40, %v543_v36  ;;  %v592_v47 = vstv %s1583_s14  ;;  %s917_s17 = sld [smem:[#allocation9 + $0x180]]  ;;  %v568_v49 = vmul.f32 %v567_v38, %v554_v37  ;;  %v921_v38 = vld [vmem:[%s1538_s15 + $0x6] sm:$0x3]  ;;  %s674_s14 = sshll.u32 %s671_s26, 4  ;;  %s675_s14 = int_to_ptr.hbm [resolvable:$true] %s674_s14 }
  0x61   : > { %v561_v48 = vadd.f32 %v560_v42, %v557_v41  ;;  %v607_v50 = vstv %s1591_s11  ;;  %s918_s25 = sld [smem:[#allocation9 + $0x181]]  ;;  %v593_v52 = vmul.f32 %v592_v47, %v554_v37  ;;  %v598_v3 = vstv %s1585_s12  ;;  %s1213_s15 = sshra.s32 %s675_s14, 4  ;;  %s1214_s15 = int_to_ptr.hbm [resolvable:$true] %s1213_s15 }
  0x62   : > { %v586_v51 = vadd.f32 %v585_v45, %v582_v44  ;;  %v608_v53 = vmul.f32 %v607_v50, %v521_v34  ;;  %v610_v54 = vstv %s912_s13  ;;  %s919_s22 = sld [smem:[#allocation9 + $0x182]]  ;;  %s1215_s12 = scalar_lea.hbm %s1214_s15, 8 }
  0x63   : > { %v565_v55 = vadd.f32 %v564_v43, %v561_v48  ;;  %v611_v56 = vmul.f32 %v610_v54, %v532_v35  ;;  %v614_v57 = vstv %s913_s21  ;;  %s920_s1 = sld [smem:[#allocation9 + $0x183]]  ;;  %p1216_p2 = scmp.ne.s32.totalorder %s1214_s15, %s1215_s12 }
  0x64   : > { %v590_v59 = vadd.f32 %v589_v46, %v586_v51  ;;  %v615_v60 = vmul.f32 %v614_v57, %v543_v36  ;;  %v618_v61 = vstv %s914_s19  ;;  %s1609_s9 = sld [smem:[#allocation10 + %s648_s5]]  ;;  %s1219_s23 = scalar_lea.hbm %s1669_s8, 16 }
  0x65   : > { %v569_v62 = vadd.f32 %v568_v49, %v565_v55  ;;  %v612_v63 = vadd.f32 %v611_v56, %v608_v53  ;;  %v619_v0 = vmul.f32 %v618_v61, %v554_v37  ;;  %v624_v19 = vstv %s1601_s27  ;;  %p1217_p4 = pnand %p1216_p2, %p1432_p10  ;;  %p1220_p11 = scmp.lt.s32.totalorder %s1214_s15, %s1669_s8 }
  0x66   : > { %v594_v2 = vadd.f32 %v593_v52, %v590_v59  ;;  %v633_v5 = vstv %s917_s17  ;;  %p1221_p13 = scmp.lt.s32.totalorder %s1219_s23, %s1215_s12 }
  0x67   : > { %v571_v6 = vmul.f32 %v570_v58, %v569_v62  ;;  %v616_v7 = vadd.f32 %v615_v60, %v612_v63  ;;  %v634_v8 = vmul.f32 %v633_v5, %v521_v34  ;;  %v636_v9 = vstv %s918_s25  ;;  %p1218_p8 = pneg %p1217_p4 }
  0x68   : > { %v595_v10 = vmul.f32 %v594_v2, %v570_v58  ;;  %v637_v11 = vmul.f32 %v636_v9, %v532_v35  ;;  %v640_v12 = vstv %s919_s22  ;;  %p1222_p0 = por %p1221_p13, %p1220_p11 }
  0x69   : > { %v575_v13 = vadd.f32 %v574_v1, %v571_v6  ;;  %v620_v15 = vadd.f32 %v619_v0, %v616_v7  ;;  %v641_v16 = vmul.f32 %v640_v12, %v543_v36  ;;  %v644_v17 = vstv %s920_s1 }
  0x6a   : > { %v599_v18 = vadd.f32 %v598_v3, %v595_v10  ;;  %v638_v20 = vadd.f32 %v637_v11, %v634_v8  ;;  %v645_v22 = vmul.f32 %v644_v17, %v554_v37  ;;  %v650_v34 = vstv %s1609_s9  ;;  %p1223_p3 = pnand %p1222_p0, %p1218_p8 }
  0x6b   : > { %v576_v23 = vsub.f32 %v575_v13, %v1555_v4  ;;  %v621_v24 = vmul.f32 %v620_v15, %v570_v58 }
  0x6c   : > { %v601_v25 = vsub.f32 %v599_v18, %v909_v14  ;;  %v642_v27 = vadd.f32 %v641_v16, %v638_v20 }
  0x6d   : > { %v577_v28 = vmul.f32 %v576_v23, %v1579_v21  ;;  %v625_v29 = vadd.f32 %v624_v19, %v621_v24 }
  0x6e   : > { %v602_v30 = vmul.f32 %v601_v25, %v1579_v21  ;;  %v646_v31 = vadd.f32 %v645_v22, %v642_v27 }
  0x6f   : > { %v578_v32 = vadd.f32 %v577_v28, %v1555_v4  ;;  %v627_v33 = vsub.f32 %v625_v29, %v915_v26 }
  0x70   : > { %v603_v35 = vadd.f32 %v909_v14, %v602_v30  ;;  %v647_v36 = vmul.f32 %v646_v31, %v570_v58 }
  0x71   : > { %579 = vst [vmem:[%s502_s20] sm:$0x3] %v578_v32  ;;  %v628_v37 = vmul.f32 %v627_v33, %v1579_v21 }
  0x72   : > { %910 = vst [vmem:[%s502_s20 + $0x2] sm:$0x3] %v603_v35  ;;  %v651_v39 = vadd.f32 %v650_v34, %v647_v36 }
  0x73   : > { %v629_v40 = vadd.f32 %v915_v26, %v628_v37 }
  0x74   : > { %v653_v4 = vsub.f32 %v651_v39, %v921_v38 }
  0x75   : > { %916 = vst [vmem:[%s502_s20 + $0x4] sm:$0x3] %v629_v40 }
  0x76   : > { %v654_v41 = vmul.f32 %v653_v4, %v1579_v21 }
  0x78   : > { %v655_v42 = vadd.f32 %v921_v38, %v654_v41 }
  0x7a   : > { %922 = vst [vmem:[%s502_s20 + $0x6] sm:$0x3] %v655_v42 }
  0x7b   : > { %1226 = shalt.err (!%p1223_p3)
}
  0x7c   : > { %s1305_s0 = smov 32   ;;  %s1306_s27 = smov 2  }
  0x7d   : > { %954 = dma.vmem_to_hbm [thread:$0]  (%p1432_p10), %s673_s30, 128, %s675_s14, %s659_s2, %s1305_s0, %s1305_s0, %s1306_s27  }
  0x7e PF: > { %s1704_s17 = sld [smem:[#allocation22_spill]]  ;;  %p980_p5 = pnand %p872_p9, %p1397_p6 }
  0x7f   : > { %s1706_s22 = sld [smem:[#allocation24_spill]] }
  0x80   : > { %p981_p7 = pneg %p980_p5 }
  0x84   : > { %s689_s1 = sand.u32 1, %s1704_s17  }
  0x85   : > { %s690_s5 = scalar_lea.sflag [#allocation4], %s689_s1 }
  0x86   : > { %1272 = dma.done.wait (%p981_p7), %s690_s5, 128  }
  0x87   : > { %1274 = vsyncadd (%p981_p7), %s690_s5, 4294967168  ;;  %s30_s10 = sadd.s32 1, %s1706_s22   ;;  %s1707_s9 = sld [smem:[#allocation27_spill]] }
  0x88   : > { %p27_p12 = scmp.ge.s32.totalorder %s30_s10, 4   ;;  %s1708_s30 = sld [smem:[#allocation23_spill]] }
  0x89   : > { %s1709_s24 = sld [smem:[#allocation26_spill]]  ;;  %s1710_s27 = smov %s1281_s28 }
  0x8a   : > { %s1711_s28 = smov %s1285_s29 }
  0x8b   :  { %29 = sbr.rel (!%p27_p12) target bundleno = 16 (0x10), region = 154 }
  0x8d   : > { %s1712_s29 = smov %s1707_s9 }
  0x8f   : > { %s1713_s9 = smov %s1709_s24 }
  0x90   :  { %696 = vsyncpa [#allocation3], 1 }
  0x91   :  { %698 = vsyncpa [#allocation3 + $0x1], 1 }
  0x92   :  { %699 = vsyncpa [#allocation13], 1 }
  0x93   :  { %701 = vsyncpa [#allocation13 + $0x1], 1 }
  0x94   :  { %702 = vsyncpa [#allocation4], 1 }
  0x95   :  { %704 = vsyncpa [#allocation4 + $0x1], 1 }
  0x96   :  { %705 = vsyncpa [#allocation5], 1 }
  0x97   :  { %707 = vsyncpa [#allocation5 + $0x1], 1 }
  0x98   :  { %708 = vsyncpa [#allocation8], 1 }
  0x99   :  { %709 = vsyncpa [#allocation6], 1 }
  0x9a   :  { %711 = vsyncpa [#allocation6 + $0x1], 1 }

</bundles_post_ra>
